<compile_context>
chip_gen: v7x
topology: tpu7x:2x2x1
jax: 0.10.0
libtpu: 0.0.40
codegen_flags: <defaults>
</compile_context>

<pallas_src>
import functools

import jax
import jax.numpy as jnp
from jax.experimental import pallas as pl
from jax.experimental.pallas import tpu as pltpu

LOWER_BOUND = 1e-5
_SOFTPLUS_THRESHOLD = 20.0
_SB = 128             # diagonal sub-block edge (lane width / rectangular-access floor)
_K_PER_STEP = 8       # sub-blocks per grid step in the manual strip path
_MANUAL_MIN_N = 1024  # switch to the manual strip path at / above this size


def _constrained_noise(raw):
    """GreaterThan constraint: thresholded softplus(raw) + lower_bound (f32)."""
    raw = raw.astype(jnp.float32)
    sp = jnp.where(
        raw > _SOFTPLUS_THRESHOLD,
        raw,
        jnp.log1p(jnp.exp(jnp.minimum(raw, _SOFTPLUS_THRESHOLD))),
    )
    return sp + jnp.float32(LOWER_BOUND)


# -----------------------------------------------------------------------------
# Path A: auto-pipelined diagonal tiles (small, 128-aligned N).
# -----------------------------------------------------------------------------
def _noise_diag_kernel(raw_ref, covar_ref, out_ref):
    # raw_ref:   (1,) f32 in SMEM — the raw_noise parameter.
    # covar_ref: (T, T) — the i-th diagonal tile of the covariance matrix.
    # out_ref:   (T, T) — same tile of the (aliased) output buffer.
    noise = _constrained_noise(raw_ref[0])
    tile = covar_ref[...]
    tm, tn = tile.shape
    rows = jax.lax.broadcasted_iota(jnp.int32, (tm, tn), 0)
    cols = jax.lax.broadcasted_iota(jnp.int32, (tm, tn), 1)
    # Diagonal blocks are square and lie on the global diagonal, so a local
    # iota compare suffices; eye * noise keeps it to one vmul + vadd per vreg.
    eye = (rows == cols).astype(tile.dtype)
    out_ref[...] = tile + eye * noise.astype(tile.dtype)


def _pick_tile(n: int) -> int:
    # n is a multiple of 128. Prefer 256 (smallest tile whose per-step DMA
    # covers the ~0.35us step overhead); drop to 128 when 256 would give an
    # odd block count, so v7x's two TensorCores split the grid evenly (and
    # traffic is halved anyway).
    if n % 256 == 0 and (n // 256) % 2 == 0:
        return 256
    return 128


# -----------------------------------------------------------------------------
# Path B: manual double-buffered 128-wide diagonal strip (large, aligned N).
# -----------------------------------------------------------------------------
def _noise_strip_kernel(raw_ref, covar_hbm, out_hbm, buf, in_sems, out_sems,
                        *, nblocks, k_per_step):
    # raw_ref:   (1,) f32 in SMEM.
    # covar_hbm: [N, N] in HBM (pl.ANY) — same buffer as out_hbm when donated.
    # out_hbm:   [N, N] in HBM (pl.ANY).
    # buf:       VMEM (2, 128, 128) double buffer.
    # in_sems / out_sems: one DMA semaphore per sub-block of this grid step.
    noise = _constrained_noise(raw_ref[0])
    rows = jax.lax.broadcasted_iota(jnp.int32, (_SB, _SB), 0)
    cols = jax.lax.broadcasted_iota(jnp.int32, (_SB, _SB), 1)
    add = (rows == cols).astype(buf.dtype) * noise.astype(buf.dtype)

    base = pl.program_id(0) * k_per_step  # first global sub-block of this step

    def diag_slice(ref, blk):
        off = pl.multiple_of(blk * _SB, _SB)
        return ref.at[pl.ds(off, _SB), pl.ds(off, _SB)]

    def in_copy(blk, slot, j):
        return pltpu.make_async_copy(diag_slice(covar_hbm, blk), buf.at[slot],
                                     in_sems.at[j])

    def out_copy(blk, slot, j):
        return pltpu.make_async_copy(buf.at[slot], diag_slice(out_hbm, blk),
                                     out_sems.at[j])

    # Prologue: sub-block `base` always exists (grid = cdiv(nblocks, k_per_step)).
    in_copy(base, 0, 0).start()

    for j in range(k_per_step):
        slot = j % 2

        @pl.when(base + j < nblocks)
        def _process(j=j, slot=slot):
            in_copy(base + j, slot, j).wait()
            if j + 1 < k_per_step:
                @pl.when(base + j + 1 < nblocks)
                def _prefetch():
                    if j >= 1:
                        # Free the other slot: its previous write-back
                        # (sub-block j-1) must land before we overwrite it.
                        out_copy(base + j - 1, 1 - slot, j - 1).wait()
                    in_copy(base + j + 1, 1 - slot, j + 1).start()
            buf[slot] = buf[slot] + add
            out_copy(base + j, slot, j).start()

    # Epilogue: wait every write-back that was started but not yet waited on,
    # so semaphores are balanced and buffers are free before the next step.
    for j in range(k_per_step):
        started = base + j < nblocks
        if j <= k_per_step - 3:
            # Write-back j was already waited in-loop iff block j+2 exists.
            need = jnp.logical_and(started, base + j + 2 >= nblocks)
        else:
            need = started

        @pl.when(need)
        def _drain(j=j):
            out_copy(base + j, j % 2, j).wait()


# -----------------------------------------------------------------------------
# Wrappers
# -----------------------------------------------------------------------------
def _noise_forward_aligned(covar, raw_noise):
    n = covar.shape[0]          # multiple of 128
    nblocks = n // _SB

    if n >= _MANUAL_MIN_N:
        # Manual double-buffered 128-wide diagonal strip (HBM traffic floor).
        k = min(_K_PER_STEP, nblocks)
        grid = (pl.cdiv(nblocks, k),)
        kernel = functools.partial(_noise_strip_kernel,
                                   nblocks=nblocks, k_per_step=k)
        return pl.pallas_call(
            kernel,
            out_shape=jax.ShapeDtypeStruct((n, n), covar.dtype),
            grid=grid,
            in_specs=[
                pl.BlockSpec(memory_space=pltpu.MemorySpace.SMEM),  # raw_noise
                pl.BlockSpec(memory_space=pl.ANY),                  # covar stays in HBM
            ],
            out_specs=pl.BlockSpec(memory_space=pl.ANY),
            scratch_shapes=[
                pltpu.VMEM((2, _SB, _SB), covar.dtype),
                pltpu.SemaphoreType.DMA((k,)),
                pltpu.SemaphoreType.DMA((k,)),
            ],
            input_output_aliases={1: 0},
            compiler_params=pltpu.CompilerParams(
                dimension_semantics=("parallel",),
                vmem_limit_bytes=32 * 1024 * 1024,
            ),
        )(raw_noise, covar)

    # Small N: auto-pipelined diagonal tiles only.
    tile = _pick_tile(n)
    grid = (n // tile,)
    return pl.pallas_call(
        _noise_diag_kernel,
        out_shape=jax.ShapeDtypeStruct((n, n), covar.dtype),
        grid=grid,
        in_specs=[
            pl.BlockSpec(memory_space=pltpu.MemorySpace.SMEM),   # raw_noise scalar
            pl.BlockSpec((tile, tile), lambda i: (i, i)),        # diagonal covar tile
        ],
        out_specs=pl.BlockSpec((tile, tile), lambda i: (i, i)),  # same diagonal tile
        input_output_aliases={1: 0},
        compiler_params=pltpu.CompilerParams(
            dimension_semantics=("parallel",),
            vmem_limit_bytes=32 * 1024 * 1024,
        ),
    )(raw_noise, covar)


def noise_forward(covar: jax.Array, raw_noise: jax.Array) -> jax.Array:
    """covar: [N, N] f32, raw_noise: [1] f32 -> covar + (softplus(raw)+lb) * I.

    To keep HBM traffic at O(N*128) (diagonal band only), the covar buffer
    must be donated — use `noise_forward_jit`. Without donation the result is
    still correct but XLA inserts a full N x N copy before the kernel.
    """
    n, n2 = covar.shape
    assert n == n2, "covariance must be square"
    raw_noise = raw_noise.astype(jnp.float32)
    if n % _SB == 0:
        return _noise_forward_aligned(covar, raw_noise)
    # Ragged N: pad to a multiple of 128 (correct O(N^2) fallback; never
    # stages the whole matrix in VMEM, so it cannot blow the VMEM limit).
    n_pad = ((n + _SB - 1) // _SB) * _SB
    padded = jnp.pad(covar, ((0, n_pad - n), (0, n_pad - n)))
    return _noise_forward_aligned(padded, raw_noise)[:n, :n]


# Primary entry point: donate covar so the in-place diagonal update really
# reuses the input HBM buffer (matches PyTorch's `covar.diagonal() += noise`).
# Callers must not reuse the original `covar` array after this call.
noise_forward_jit = jax.jit(noise_forward, donate_argnums=(0,))


# -----------------------------------------------------------------------------
# Self test
# -----------------------------------------------------------------------------
def _run_case(n: int, *, donate: bool) -> None:
    key = jax.random.PRNGKey(0)
    a = jax.random.normal(key, (n, n), dtype=jnp.float32)
    covar = (a @ a.T) / n

    # Parameter initialized as in __init__: raw_noise = zeros(1)
    raw_noise = jnp.zeros((1,), dtype=jnp.float32)

    # Reference computed BEFORE the kernel call (covar may be donated).
    noise_val = jnp.log1p(jnp.exp(raw_noise[0])) + LOWER_BOUND
    expected = covar + noise_val * jnp.eye(n, dtype=jnp.float32)
    expected = jax.block_until_ready(expected)

    fn = noise_forward_jit if donate else jax.jit(noise_forward)
    out = jax.block_until_ready(fn(covar, raw_noise))

    assert out.shape == (n, n) and out.dtype == jnp.float32
    assert jnp.allclose(out, expected, atol=1e-6, rtol=1e-6), f"mismatch at N={n}"


if __name__ == "__main__":
    _run_case(256, donate=True)    # auto path, tile=128, grid=(2,)
    _run_case(512, donate=True)    # auto path, tile=256, grid=(2,)
    _run_case(1280, donate=True)   # manual strip path: 10 sub-blocks, partial 2nd step
    _run_case(200, donate=False)   # ragged N: pad-to-128 fallback (non-donating path)
    # TODO(synk): the `noise` setter / constraint.inverse_transform is parameter
    # mutation outside the forward pass and is not implemented here.
    print("KERNEL_OK")
</pallas_src>

<mosaic_0001>
module attributes {stable_mosaic.version = 11 : i64} {
  func.func @_noise_diag_kernel(%arg0: i32, %arg1: memref<1xf32, #tpu.memory_space<smem>>, %arg2: memref<128x128xf32, #tpu.memory_space<vmem>>, %arg3: memref<128x128xf32, #tpu.memory_space<vmem>>) attributes {dimension_semantics = [#tpu.dimension_semantics<parallel>], iteration_bounds = array<i64: 2>, scalar_prefetch = 0 : i64, scratch_operands = 0 : i64, tpu.core_type = #tpu.core_type<tc>, window_params = [{transform_indices = @transform_0, window_bounds = array<i64: 1>}, {transform_indices = @transform_1, window_bounds = array<i64: 128, 128>}, {transform_indices = @transform_2, window_bounds = array<i64: 128, 128>}]} {
    %c0 = arith.constant 0 : index
    %0 = memref.load %arg1[%c0] : memref<1xf32, #tpu.memory_space<smem>>
    %cst = arith.constant 2.000000e+01 : f32
    %1 = arith.cmpf ogt, %0, %cst : f32
    %cst_0 = arith.constant 2.000000e+01 : f32
    %2 = arith.minimumf %0, %cst_0 : f32
    %3 = math.exp %2 : f32
    %4 = math.log1p %3 : f32
    %5 = arith.select %1, %0, %4 : f32
    %cst_1 = arith.constant 9.99999974E-6 : f32
    %6 = arith.addf %5, %cst_1 : f32
    %c0_2 = arith.constant 0 : index
    %c0_3 = arith.constant 0 : index
    %7 = vector.load %arg2[%c0_2, %c0_3] : memref<128x128xf32, #tpu.memory_space<vmem>>, vector<128x128xf32>
    %8 = tpu.iota {dimensions = array<i32: 0>} : vector<128x128xi32>
    %9 = tpu.iota {dimensions = array<i32: 1>} : vector<128x128xi32>
    %10 = arith.cmpi eq, %8, %9 : vector<128x128xi32>
    %11 = arith.extui %10 : vector<128x128xi1> to vector<128x128xi32>
    %12 = arith.sitofp %11 : vector<128x128xi32> to vector<128x128xf32>
    %13 = vector.broadcast %6 : f32 to vector<128x128xf32>
    %14 = arith.mulf %12, %13 : vector<128x128xf32>
    %15 = arith.addf %7, %14 : vector<128x128xf32>
    %c0_4 = arith.constant 0 : index
    %c0_5 = arith.constant 0 : index
    %16 = vector.load %arg3[%c0_4, %c0_5] : memref<128x128xf32, #tpu.memory_space<vmem>>, vector<128x128xf32>
    tpu.vector_store %arg3[%c0_4, %c0_5], %15 {strides = array<i32>} : memref<128x128xf32, #tpu.memory_space<vmem>>, vector<128x128xf32>,
    return
  }
  func.func @transform_0(%arg0: i32) -> i32 {
    %c0_i32 = arith.constant 0 : i32
    %c0_i32_0 = arith.constant 0 : i32
    return %c0_i32 : i32
  }
  func.func @transform_1(%arg0: i32) -> (i32, i32) {
    %c0_i32 = arith.constant 0 : i32
    return %arg0, %arg0 : i32, i32
  }
  func.func @transform_2(%arg0: i32) -> (i32, i32) {
    %c0_i32 = arith.constant 0 : i32
    return %arg0, %arg0 : i32, i32
  }
}

</mosaic_0001>

<bundles_post_ra>
// kernel: noise_forward.1
= control target key start
LH: loop header
LB: loop body
LE: loop exit
PB: predicated region body
PF: predicated region fallthrough
CT: control target
= control target key end

     0   :  { %s869_s0 = inlined_call_operand.<no memory space> [shape: f32[1], index: 0, kind: input, shape index: {}]   ;;  %s870_s1 = inlined_call_operand.hbm [shape: f32[256,256], index: 1, kind: input, shape index: {}, may-alias: {1,2}]   ;;  %s871_s2 = inlined_call_operand.hbm [shape: f32[256,256], index: 2, kind: output, shape index: {}, may-alias: {1,2}]  }
   0x1   :  { %7 = sst [smem:[#allocation2]] %s869_s0 }
   0x2   :  { %8 = vsyncpa [#allocation4], 0 }
   0x3   :  { %10 = vsyncpa [#allocation4 + $0x1], 0 }
   0x4   :  { %11 = vsyncpa [#allocation5], 0 }
   0x5   :  { %13 = vsyncpa [#allocation5 + $0x1], 0  ;;  %s638_s11 = smov 0   ;;  %s640_s12 = smov 0  }
   0x6   :  { %s642_s13 = smov 0   ;;  %s644_s14 = smov 0  }
   0x7 LB: > { %s659_s0 = sadd.s32 4294967295, %s608_s14   ;;  %s416_s15 = sadd.s32 4294967294, %s608_s14   ;;  %s608_s14 = sphi %s644_s14, %s884_s14   ;;  %s604_s13 = sphi %s642_s13, %s883_s13   ;;  %s600_s12 = sphi %s640_s12, %s882_s12   ;;  %s596_s11 = sphi %s638_s11, %s881_s11  }
   0x8   : > { %s663_s16 = sadd.s32 1, %s608_s14   ;;  %s49_s17 = sadd.s32 1, %s604_s13 }
   0x9   : > { %s44_s18 = ssub.s32 %s608_s14, %s663_s16  ;;  %p56_p0 = scmp.ne.s32.totalorder %s604_s13, %s600_s12 }
   0xa   : > { %s46_s19 = sor.u32 %s44_s18, %s44_s18  ;;  %p57_p1 = scmp.eq.s32.totalorder %s608_s14, 0 }
   0xb   : > { %p47_p2 = scmp.eq.s32.totalorder %s46_s19, 0  ;;  %p62_p3 = scmp.ne.s32.totalorder %s600_s12, %s596_s11 }
   0xc   : > { %p673_p4 = por %p57_p1, %p56_p0  ;;  %p63_p5 = scmp.eq.s32.totalorder %s659_s0, 0 }
   0xd   : > { %s679_s21 = scalar_select %p47_p2, %s604_s13, %s49_s17  }
   0xe   : > { %p681_p6 = por %p63_p5, %p62_p3  ;;  %p88_p7 = scmp.eq.s32.totalorder %s659_s0, 1 }
   0xf   : > { %p94_p8 = scmp.eq.s32.totalorder %s416_s15, 1  ;;  %p466_p11 = scmp.lt.s32.totalorder %s608_s14, 2 }
  0x10   : > { %p687_p10 = por %p88_p7, %p56_p0  ;;  %s117_s25 = sand.u32 1, %s604_s13  }
  0x11   : > { %p692_p12 = por %p94_p8, %p62_p3  ;;  %s419_s26 = sshll.u32 %s117_s25, 7 }
  0x12   : > { %s875_s23 = scalar_select %p687_p10, 1, 0 }
  0x13   : > { %s876_s24 = scalar_select %p692_p12, 1, 0 }
  0x14   : > { %s448_s27 = sshll.u32 %s608_s14, 5  ;;  %s121_s29 = scalar_lea.vmem [#allocation3], %s419_s26 }
  0x15   : > { %s127_s28 = sadd.s32 %s608_s14, %s448_s27  ;;  %s130_s30 = sshll.u32 %s121_s29, 4  ;;  %s699_s30 = int_to_ptr.vmem [resolvable:$true] %s130_s30 }
  0x16   : > { %s422_s3 = sshll.u32 %s127_s28, 7  ;;  %p708_p13 = pnand %p466_p11, %p673_p4 }
  0x17   : > { %s704_s6 = scalar_lea.hbm %s870_s1, %s422_s3  ;;  %s712_s8 = scalar_lea.sflag [#allocation4], %s117_s25 }
  0x18   : > { %s512_s9 = scalar_lea.hbm %s704_s6, 2048  ;;  %p514_p1 = pneg %p708_p13 }
  0x19   : > { %p513_p0 = scmp.ne.s32.totalorder %s704_s6, %s512_s9  ;;  %s517_s17 = scalar_lea.hbm %s870_s1, 8192 }
  0x1a   : > { %p518_p4 = scmp.lt.u32.totalorder %s704_s6, %s870_s1  ;;  %p519_p5 = scmp.lt.u32.totalorder %s517_s17, %s512_s9 }
  0x1b   : > { %p515_p2 = pnand %p514_p1, %p513_p0  ;;  %p521_p8 = scmp.lt.u32.totalorder %s512_s9, %s704_s6 }
  0x1c   : > { %p520_p7 = por %p519_p5, %p518_p4 }
  0x1d   : > { %p516_p3 = pneg %p515_p2 }
  0x1e   : > { %p522_p11 = por %p521_p8, %p520_p7 }
  0x20   : > { %p523_p9 = pnand %p522_p11, %p516_p3 }
  0x22   : > { %526 = shalt.err (!%p523_p9)
}
  0x23   : > { %s527_s20 = scalar_lea.vmem %s699_s30, 2048  ;;  %s610_s25 = smov [#allocation3]  }
  0x24   : > { %p528_p0 = scmp.ne.s32.totalorder %s699_s30, %s527_s20  ;;  %s532_s26 = sshll.u32 %s610_s25, 4  ;;  %s533_s26 = int_to_ptr.vmem [resolvable:$false] %s532_s26 }
  0x25   : > { %s534_s27 = scalar_lea.vmem %s533_s26, 4096  ;;  %p535_p10 = scmp.lt.s32.totalorder %s699_s30, %s533_s26 }
  0x26   : > { %p530_p2 = pnand %p528_p0, %p514_p1  ;;  %p536_p4 = scmp.lt.s32.totalorder %s534_s27, %s527_s20 }
  0x28   : > { %p531_p12 = pneg %p530_p2  ;;  %p537_p5 = por %p536_p4, %p535_p10 }
  0x2a   : > { %p538_p7 = pnand %p537_p5, %p531_p12 }
  0x2c   : > { %541 = shalt.err (!%p538_p7)
}
  0x2d   : > { %s611_s28 = smov 256   ;;  %s612_s29 = smov 128  }
  0x2e   : > { %s613_s3 = smov 8   ;;  %p423_p9 = scmp.ge.s32.totalorder %s608_s14, 1 }
  0x2f   : > { %461 = dma.hbm_to_vmem [thread:$0]  (!%p708_p13), %s704_s6, 2048, %s699_s30, %s712_s8, %s611_s28, %s612_s29, %s613_s3  }
  0x30   : > { %p138_p1 = scmp.lt.s32.totalorder %s608_s14, 3 }
  0x32   : > { %p139_p3 = pnand %p423_p9, %p138_p1 }
  0x33   : > { %s743_s4 = sand.u32 (!%p139_p3), 1, %s600_s12  }
  0x34   : > { %142 = sbr.rel (%p139_p3) target bundleno = 232 (0xe8), region = 28  ;;  %s424_s5 = sshll.u32 (!%p139_p3), %s743_s4, 7 }
  0x35   : > { %s145_s9 = scalar_lea.sflag (!%p139_p3), [#allocation4], %s743_s4  ;;  %s749_s10 = scalar_lea.vmem (!%p139_p3), [#allocation3], %s424_s5 }
  0x3b   : > { %587 = dma.done.wait (%p681_p6), %s145_s9, 2048  }
  0x3c   : > { %589 = vsyncadd (%p681_p6), %s145_s9, 4294965248  ;;  %s755_s30 = sld [smem:[#allocation2]]  ;;  %s614_s6 = smov 20.0   ;;  %v207_v12 = vlaneseq  ;;  %v615_v30 = vmov 0.0   ;;  %v191_v44 = vld [vmem:[%s749_s10] sm:$0xff]  ;;  %v192_v49 = vld [vmem:[%s749_s10 + $0x8] sm:$0xff] }
  0x3d   : > { %s449_s15 = sshll.u32 %s659_s0, 5  ;;  %v193_v50 = vld [vmem:[%s749_s10 + $0x10] sm:$0xff]  ;;  %v194_v51 = vld [vmem:[%s749_s10 + $0x18] sm:$0xff]  ;;  %v195_v56 = vld [vmem:[%s749_s10 + $0x20] sm:$0xff]  ;;  %s798_s19 = scalar_lea.vmem [#allocation6], %s424_s5 }
  0x3e   : > { %v208_v13 = vshrl.u32 %v207_v12, 7  ;;  %v225_v15 = vand.u32 127, %v207_v12  ;;  %s781_s18 = sadd.s32 %s449_s15, %s659_s0  ;;  %v196_v57 = vld [vmem:[%s749_s10 + $0x28] sm:$0xff]  ;;  %v197_v58 = vld [vmem:[%s749_s10 + $0x30] sm:$0xff]  ;;  %v198_v63 = vld [vmem:[%s749_s10 + $0x38] sm:$0xff]  ;;  %s339_s20 = sshll.u32 %s798_s19, 4  ;;  %s813_s20 = int_to_ptr.vmem [resolvable:$true] %s339_s20 }
  0x3f   : > { %s445_s0 = sshll.u32 %s781_s18, 7  ;;  %s324_s28 = scalar_lea.sflag [#allocation5], %s743_s4 }
  0x40   : > { %v209_v14 = vadd.s32 8, %v208_v13  ;;  %v210_v16 = vadd.s32 16, %v208_v13  ;;  %v211_v17 = vadd.s32 24, %v208_v13  ;;  %v212_v18 = vadd.s32 32, %v208_v13  ;;  %s807_s27 = scalar_lea.hbm %s871_s2, %s445_s0  ;;  %s542_s29 = scalar_lea.vmem %s813_s20, 2048 }
  0x41   : > { %v213_v19 = vadd.s32 40, %v208_v13  ;;  %v214_v20 = vadd.s32 48, %v208_v13  ;;  %v215_v21 = vadd.s32 56, %v208_v13  ;;  %v216_v22 = vadd.s32 64, %v208_v13  ;;  %p543_p10 = scmp.ne.s32.totalorder %s813_s20, %s542_s29  ;;  %p878_p12 = scmp.ne.s32.totalorder %s875_s23, 0 }
  0x42   : > { %s173_s7 = smin.f32 %s614_s6, %s755_s30  ;;  %v217_v23 = vadd.s32 72, %v208_v13  ;;  %v218_v24 = vadd.s32 80, %v208_v13  ;;  %v219_v25 = vadd.s32 88, %v208_v13  ;;  %v220_v26 = vadd.s32 96, %v208_v13  ;;  %p172_p6 = scmp.gt.f32.partialorder %s755_s30, 20.0 }
  0x43   : > { %v174_v0 = vstv %s173_s7  ;;  %v221_v27 = vadd.s32 104, %v208_v13  ;;  %v222_v28 = vadd.s32 112, %v208_v13  ;;  %v223_v29 = vadd.s32 120, %v208_v13  ;;  %p544_p13 = pnand %p543_p10, %p878_p12  ;;  %s616_s3 = smov [#allocation6]  }
  0x44   : > { %v175_v1 = vmul.f32 1.442695, %v174_v0  ;;  %vm226_vm1 = vcmp.eq.s32.totalorder %v208_v13, %v225_v15  ;;  %vm227_vm2 = vcmp.eq.s32.totalorder %v209_v14, %v225_v15  ;;  %vm228_vm3 = vcmp.eq.s32.totalorder %v210_v16, %v225_v15  ;;  %v199_v0 = vld [vmem:[%s749_s10 + $0x40] sm:$0xff]  ;;  %v204_v13 = vld [vmem:[%s749_s10 + $0x68] sm:$0xff]  ;;  %v205_v14 = vld [vmem:[%s749_s10 + $0x70] sm:$0xff]  ;;  %s546_s5 = sshll.u32 %s616_s3, 4  ;;  %s547_s5 = int_to_ptr.vmem [resolvable:$false] %s546_s5 }
  0x45   : > { %vm229_vm4 = vcmp.eq.s32.totalorder %v211_v17, %v225_v15  ;;  %vm230_vm5 = vcmp.eq.s32.totalorder %v212_v18, %v225_v15  ;;  %vm231_vm6 = vcmp.eq.s32.totalorder %v213_v19, %v225_v15  ;;  %vm232_vm7 = vcmp.eq.s32.totalorder %v214_v20, %v225_v15  ;;  %p545_p8 = pneg %p544_p13  ;;  %s548_s9 = scalar_lea.vmem %s547_s5, 4096 }
  0x46   : > { %508 = vpow2.f32 %v175_v1  ;;  %vm233_vm8 = vcmp.eq.s32.totalorder %v215_v21, %v225_v15  ;;  %vm234_vm9 = vcmp.eq.s32.totalorder %v216_v22, %v225_v15  ;;  %vm235_vm10 = vcmp.eq.s32.totalorder %v217_v23, %v225_v15  ;;  %v200_v1 = vld [vmem:[%s749_s10 + $0x48] sm:$0xff]  ;;  %p549_p11 = scmp.lt.s32.totalorder %s813_s20, %s547_s5  ;;  %p550_p0 = scmp.lt.s32.totalorder %s548_s9, %s542_s29 }
  0x47   : > { %vm236_vm11 = vcmp.eq.s32.totalorder %v218_v24, %v225_v15  ;;  %vm237_vm12 = vcmp.eq.s32.totalorder %v219_v25, %v225_v15  ;;  %vm238_vm13 = vcmp.eq.s32.totalorder %v220_v26, %v225_v15  ;;  %vm239_vm14 = vcmp.eq.s32.totalorder %v221_v27, %v225_v15 }
  0x48   : > { %vm240_vm15 = vcmp.eq.s32.totalorder %v222_v28, %v225_v15  ;;  %v426_v31 = vsel %vm226_vm1, 1.0, %v615_v30  ;;  %v427_v32 = vsel %vm227_vm2, 1.0, %v615_v30  ;;  %v428_v33 = vsel %vm228_vm3, 1.0, %v615_v30  ;;  %p551_p2 = por %p550_p0, %p549_p11 }
  0x49   : > { %v429_v34 = vsel %vm229_vm4, 1.0, %v615_v30  ;;  %v430_v35 = vsel %vm230_vm5, 1.0, %v615_v30  ;;  %v431_v36 = vsel %vm231_vm6, 1.0, %v615_v30  ;;  %v432_v37 = vsel %vm232_vm7, 1.0, %v615_v30 }
  0x4a   : > { %v433_v38 = vsel %vm233_vm8, 1.0, %v615_v30  ;;  %v434_v39 = vsel %vm234_vm9, 1.0, %v615_v30  ;;  %v435_v40 = vsel %vm235_vm10, 1.0, %v615_v30  ;;  %v436_v41 = vsel %vm236_vm11, 1.0, %v615_v30  ;;  %p552_p4 = pnand %p551_p2, %p545_p8 }
  0x4b   : > { %v437_v42 = vsel %vm237_vm12, 1.0, %v615_v30  ;;  %v438_v43 = vsel %vm238_vm13, 1.0, %v615_v30  ;;  %v439_v45 = vsel %vm239_vm14, 1.0, %v615_v30  ;;  %v440_v46 = vsel %vm240_vm15, 1.0, %v615_v30 }
  0x50   : > { %v509_v2 = vpop.eup %508 }
  0x51   : > { %450 = vpush %v509_v2 }
  0x82   : > { %s451_s8 = spop %450 }
  0x83   : > { %v178_v3 = vstv %s451_s8 }
  0x84   : > { %v179_v4 = vadd.f32 1.0, %v178_v3  ;;  %v182_v5 = vmul.f32 -0.5, %v178_v3  ;;  %v185_v7 = vand.u32 2147483647, %v178_v3 }
  0x86   : > { %510 = vlog2.f32 %v179_v4  ;;  %v183_v6 = vadd.f32 1.0, %v182_v5  ;;  %vm186_vm0 = vcmp.lt.f32.partialorder %v185_v7, 0.0004427343  ;;  %v202_v7 = vld [vmem:[%s749_s10 + $0x58] sm:$0xff] }
  0x88   : > { %v184_v9 = vmul.f32 %v183_v6, %v178_v3  ;;  %v201_v6 = vld [vmem:[%s749_s10 + $0x50] sm:$0xff] }
  0x90   : > { %v511_v8 = vpop.eup %510 }
  0x91   : > { %v181_v10 = vmul.f32 0.6931472, %v511_v8  ;;  %v203_v8 = vld [vmem:[%s749_s10 + $0x60] sm:$0xff] }
  0x93   : > { %v187_v11 = vsel %vm186_vm0, %v184_v9, %v181_v10  ;;  %vm241_vm0 = vcmp.eq.s32.totalorder %v223_v29, %v225_v15  ;;  %v206_v15 = vld [vmem:[%s749_s10 + $0x78] sm:$0xff] }
  0x94   : > { %452 = vpush %v187_v11  ;;  %v441_v47 = vsel %vm241_vm0, 1.0, %v615_v30 }
  0xc5   : > { %s453_s22 = spop %452 }
  0xc6   : > { %s886_s30 = smov (!%p172_p6, %s755_s30), %s453_s22 }
  0xc7   : > { %s190_s17 = sadd.f32 1e-05, %s886_s30 }
  0xc9   : > { %v274_v48 = vstv %s190_s17 }
  0xca   : > { %v275_v52 = vmul.f32 %v426_v31, %v274_v48  ;;  %v276_v53 = vmul.f32 %v427_v32, %v274_v48  ;;  %v277_v54 = vmul.f32 %v428_v33, %v274_v48  ;;  %v278_v55 = vmul.f32 %v429_v34, %v274_v48 }
  0xcb   : > { %v279_v59 = vmul.f32 %v430_v35, %v274_v48  ;;  %v280_v60 = vmul.f32 %v431_v36, %v274_v48  ;;  %v281_v61 = vmul.f32 %v432_v37, %v274_v48  ;;  %v282_v62 = vmul.f32 %v433_v38, %v274_v48 }
  0xcc   : > { %v283_v2 = vmul.f32 %v434_v39, %v274_v48  ;;  %v284_v3 = vmul.f32 %v435_v40, %v274_v48  ;;  %v285_v4 = vmul.f32 %v436_v41, %v274_v48  ;;  %v286_v5 = vmul.f32 %v437_v42, %v274_v48 }
  0xcd   : > { %v287_v9 = vmul.f32 %v438_v43, %v274_v48  ;;  %v288_v10 = vmul.f32 %v439_v45, %v274_v48  ;;  %v289_v11 = vmul.f32 %v440_v46, %v274_v48  ;;  %v290_v12 = vmul.f32 %v441_v47, %v274_v48 }
  0xce   : > { %v291_v16 = vadd.f32 %v275_v52, %v191_v44  ;;  %v292_v17 = vadd.f32 %v276_v53, %v192_v49  ;;  %v293_v18 = vadd.f32 %v277_v54, %v193_v50  ;;  %v294_v19 = vadd.f32 %v278_v55, %v194_v51 }
  0xcf   : > { %v295_v20 = vadd.f32 %v279_v59, %v195_v56  ;;  %v296_v21 = vadd.f32 %v280_v60, %v196_v57  ;;  %v297_v22 = vadd.f32 %v281_v61, %v197_v58  ;;  %v298_v23 = vadd.f32 %v282_v62, %v198_v63 }
  0xd0   : > { %v299_v24 = vadd.f32 %v283_v2, %v199_v0  ;;  %v300_v25 = vadd.f32 %v284_v3, %v200_v1  ;;  %v301_v26 = vadd.f32 %v285_v4, %v201_v6  ;;  %v302_v27 = vadd.f32 %v286_v5, %v202_v7  ;;  %307 = vst [vmem:[%s798_s19] sm:$0xff] %v291_v16 }
  0xd1   : > { %308 = vst [vmem:[%s798_s19 + $0x8] sm:$0xff] %v292_v17  ;;  %309 = vst [vmem:[%s798_s19 + $0x10] sm:$0xff] %v293_v18  ;;  %v303_v28 = vadd.f32 %v287_v9, %v203_v8  ;;  %v304_v29 = vadd.f32 %v288_v10, %v204_v13  ;;  %v305_v30 = vadd.f32 %v289_v11, %v205_v14 }
  0xd2   : > { %310 = vst [vmem:[%s798_s19 + $0x18] sm:$0xff] %v294_v19  ;;  %v306_v31 = vadd.f32 %v290_v12, %v206_v15  ;;  %311 = vst [vmem:[%s798_s19 + $0x20] sm:$0xff] %v295_v20 }
  0xd3   : > { %312 = vst [vmem:[%s798_s19 + $0x28] sm:$0xff] %v296_v21  ;;  %313 = vst [vmem:[%s798_s19 + $0x30] sm:$0xff] %v297_v22 }
  0xd4   : > { %314 = vst [vmem:[%s798_s19 + $0x38] sm:$0xff] %v298_v23  ;;  %315 = vst [vmem:[%s798_s19 + $0x40] sm:$0xff] %v299_v24 }
  0xd5   : > { %316 = vst [vmem:[%s798_s19 + $0x48] sm:$0xff] %v300_v25  ;;  %317 = vst [vmem:[%s798_s19 + $0x50] sm:$0xff] %v301_v26 }
  0xd6   : > { %318 = vst [vmem:[%s798_s19 + $0x58] sm:$0xff] %v302_v27  ;;  %319 = vst [vmem:[%s798_s19 + $0x60] sm:$0xff] %v303_v28 }
  0xd7   : > { %320 = vst [vmem:[%s798_s19 + $0x68] sm:$0xff] %v304_v29  ;;  %321 = vst [vmem:[%s798_s19 + $0x70] sm:$0xff] %v305_v30 }
  0xd8   : > { %322 = vst [vmem:[%s798_s19 + $0x78] sm:$0xff] %v306_v31 }
  0xd9   : > { %555 = shalt.err (!%p552_p4)
}
  0xda   : > { %s556_s10 = scalar_lea.hbm %s807_s27, 2048  ;;  %s560_s7 = scalar_lea.hbm %s871_s2, 8192 }
  0xdb   : > { %p557_p5 = scmp.ne.s32.totalorder %s807_s27, %s556_s10  ;;  %p561_p1 = scmp.lt.u32.totalorder %s807_s27, %s871_s2 }
  0xdc   : > { %p562_p3 = scmp.lt.u32.totalorder %s560_s7, %s556_s10  ;;  %p564_p10 = scmp.lt.u32.totalorder %s556_s10, %s807_s27 }
  0xdd   : > { %p558_p7 = pnand %p557_p5, %p878_p12 }
  0xde   : > { %p563_p6 = por %p562_p3, %p561_p1 }
  0xdf   : > { %p559_p9 = pneg %p558_p7 }
  0xe0   : > { %p565_p13 = por %p564_p10, %p563_p6 }
  0xe2   : > { %p566_p8 = pnand %p565_p13, %p559_p9 }
  0xe4   : > { %569 = shalt.err (!%p566_p8)
}
  0xe5   : > { %s617_s15 = smov 128   ;;  %s618_s17 = smov 256  }
  0xe6   : > { %s619_s18 = smov 8  }
  0xe7   : > { %456 = dma.vmem_to_hbm [thread:$0]  (%p878_p12), %s813_s20, 2048, %s807_s27, %s324_s28, %s617_s15, %s618_s17, %s619_s18  }
  0xe8 PF: > { %s354_s0 = sand.u32 1, %s596_s11   ;;  %p879_p11 = scmp.ne.s32.totalorder %s876_s24, 0 }
  0xe9   : > { %p880_p0 = scmp.ge.s32.totalorder %s608_s14, 2  ;;  %s355_s19 = scalar_lea.sflag [#allocation5], %s354_s0 }
  0xeb   : > { %p463_p2 = pnand %p880_p0, %p879_p11 }
  0xed   : > { %591 = dma.done.wait (!%p463_p2), %s355_s19, 2048  }
  0xee   : > { %593 = vsyncadd (!%p463_p2), %s355_s19, 4294965248  ;;  %p16_p4 = scmp.ge.s32.totalorder %s663_s16, 4   ;;  %s881_s11 = smov %s600_s12 }
  0xef   : > { %s882_s12 = smov %s604_s13  ;;  %s883_s13 = smov %s679_s21 }
  0xf0   : > { %s884_s14 = smov %s663_s16  ;;  %18 = sbr.rel (!%p16_p4) target bundleno = 7 (0x7), region = 73 }
  0xf7   :  { %360 = vsyncpa [#allocation4], 1 }
  0xf8   :  { %362 = vsyncpa [#allocation4 + $0x1], 1 }
  0xf9   :  { %363 = vsyncpa [#allocation5], 1 }
  0xfa   :  { %365 = vsyncpa [#allocation5 + $0x1], 1 }

</bundles_post_ra>
